<compile_context>
chip_gen: v7x
topology: tpu7x:2x2x1
jax: 0.10.0
libtpu: 0.0.40
codegen_flags: <defaults>
</compile_context>

<pallas_src>
import functools

import jax
import jax.numpy as jnp
from jax.experimental import pallas as pl
from jax.experimental.pallas import tpu as pltpu

LANES = 128
SUBLANES = 8
ACC_GROUPS = 4                    # K independent accumulator groups (breaks the vadd chain)
ACC_ROWS = ACC_GROUPS * SUBLANES  # 32 rows -- also >= bf16(16)/int8(32) min sublane tiles


def _round_up(x: int, m: int) -> int:
    return -(-x // m) * m


def _device_defaults():
    """Per-generation defaults: tile size, chunk count, v7x flag.

    v7x: 2 TensorCores + 3.2 TB/s HBM -> bigger tiles, 2 'parallel' chunks,
    deeper input buffering.  v5e/v6e: single TC -> no chunk axis.
    """
    try:
        kind = jax.devices()[0].device_kind.lower()
    except Exception:
        kind = ""
    is_v7 = "v7" in kind
    tile_rows = 4096 if is_v7 else 2048   # 2 MiB / 1 MiB f32 per input per pipeline buffer
    num_chunks = 2 if is_v7 else 1
    return tile_rows, num_chunks, is_v7


def _sq_diff_sum_kernel(pred_ref, true_ref, out_ref, *,
                        tile_rows: int, steps_per_chunk: int, valid_rows: int):
    """Accumulate per-(row-group, lane) partial sums of (pred - true)^2 into the
    resident (ACC_ROWS, 128) output block.  One output block per chunk."""
    blk = pl.program_id(0) * steps_per_chunk + pl.program_id(1)
    row_start = blk * tile_rows

    @pl.when(pl.program_id(1) == 0)
    def _():
        out_ref[...] = jnp.zeros_like(out_ref)

    def accumulate(mask_tail: bool):
        d = pred_ref[...].astype(jnp.float32) - true_ref[...].astype(jnp.float32)
        sq = d * d
        if mask_tail:
            # Rows past `valid_rows` hold stale VMEM (partial last block or a
            # clamped duplicate block) -> zero their contribution.
            local_row = jax.lax.broadcasted_iota(jnp.int32, sq.shape, 0)
            sq = jnp.where(row_start + local_row < valid_rows, sq, 0.0)
        # (tile_rows,128) -> (tile_rows//32, 32, 128); summing the leading axis
        # is pure VPU vreg adds split over 4 independent accumulator groups.
        out_ref[...] += sq.reshape(-1, ACC_ROWS, LANES).sum(axis=0)

    # Fast path: fully-valid tile (no mask cost in the steady state).
    @pl.when(row_start + tile_rows <= valid_rows)
    def _():
        accumulate(False)

    # Slow path: ragged last tile (runs at most once per chunk).
    @pl.when(row_start + tile_rows > valid_rows)
    def _():
        accumulate(True)


def default_scale(epoch: int) -> float:
    """Exact port of EpochAwareLoss.default_scale."""
    e150 = int(epoch / 150)
    if e150 > 0:
        return (1.0 / 10.0) ** (e150 * 0.9)
    return 1.0


def epoch_aware_mse_loss(pred: jax.Array,
                         true: jax.Array,
                         epoch: int = 0,
                         *,
                         tile_rows: int = None,
                         num_chunks: int = None) -> jax.Array:
    assert pred.shape == true.shape, f"pred.shape={pred.shape}   true.shape={true.shape}"
    n = pred.size

    dev_tile, dev_chunks, is_v7 = _device_defaults()
    if tile_rows is None:
        tile_rows = dev_tile
    if num_chunks is None:
        num_chunks = dev_chunks

    rows = -(-n // LANES)                                   # ceil(n / 128)
    tile_rows = max(ACC_ROWS, min(tile_rows, _round_up(rows, ACC_ROWS)))
    tile_rows = _round_up(tile_rows, ACC_ROWS)              # multiple of 32 sublanes
    rows_p = max(rows, tile_rows)                           # >= one full tile for tiny inputs

    num_row_blocks = -(-rows_p // tile_rows)
    num_chunks = max(1, min(num_chunks, num_row_blocks))
    steps_per_chunk = -(-num_row_blocks // num_chunks)

    p = jnp.ravel(pred)
    t = jnp.ravel(true)
    padded = rows_p * LANES
    if padded != n:
        # Only the sub-128 / sub-tile remnant is zero-padded (zeros add 0 to the
        # sum).  Aligned inputs take the zero-copy path above; the partial last
        # tile is handled by in-kernel masking, not by padding to tile multiples.
        # TODO(synk): a fully copy-free ragged tail would need a manual-DMA
        # (memory_space=pl.ANY) epilogue; not worth it for a <128-element remnant.
        p = jnp.pad(p, (0, padded - n))
        t = jnp.pad(t, (0, padded - n))
    p2 = p.reshape(rows_p, LANES)
    t2 = t.reshape(rows_p, LANES)

    # Chunking via index-map arithmetic.  Clamp only when the split is uneven so
    # the extra steps of the last chunk re-read (and fully mask) the last block.
    if num_chunks * steps_per_chunk == num_row_blocks:
        def in_map(c, i):
            return (c * steps_per_chunk + i, 0)
    else:
        last_block = num_row_blocks - 1

        def in_map(c, i):
            return (jnp.minimum(c * steps_per_chunk + i, last_block), 0)

    in_spec = pl.BlockSpec((tile_rows, LANES), in_map)
    if is_v7:
        # Deeper input pipelining hides DMA issue jitter at 3.2 TB/s.
        # TODO(synk): sweep Buffered(2) vs Buffered(3) on real v7x hardware.
        in_spec = pl.BlockSpec((tile_rows, LANES), in_map, pipeline_mode=pl.Buffered(3))

    kernel = functools.partial(_sq_diff_sum_kernel,
                               tile_rows=tile_rows,
                               steps_per_chunk=steps_per_chunk,
                               valid_rows=rows_p)

    itemsize = jnp.dtype(pred.dtype).itemsize
    cost = pl.CostEstimate(
        flops=3 * n,
        transcendentals=0,
        bytes_accessed=2 * n * itemsize + num_chunks * ACC_ROWS * LANES * 4,
    )

    partial = pl.pallas_call(
        kernel,
        out_shape=jax.ShapeDtypeStruct((num_chunks, ACC_ROWS, LANES), jnp.float32),
        grid=(num_chunks, steps_per_chunk),
        in_specs=[in_spec, in_spec],
        out_specs=pl.BlockSpec((pl.Squeezed(), ACC_ROWS, LANES), lambda c, i: (c, 0, 0)),
        compiler_params=pltpu.CompilerParams(
            # TODO(synk): on v7x verify via xprof that the 'parallel' chunk axis
            # actually shards across the 2 TensorCores; if not, switch axis 0 to
            # pltpu.CORE_PARALLEL.
            dimension_semantics=("parallel", "arbitrary"),
            vmem_limit_bytes=32 * 1024 * 1024,   # well within v5e/v6e/v7x budgets
        ),
        cost_estimate=cost,
    )(p2, t2)

    # Tiny final reduce (num_chunks*32*128 floats) + fold the MSE mean (1/N)
    # and the epoch-dependent scale into a single multiply.
    return jnp.sum(partial) * jnp.float32(default_scale(epoch) / n)


if __name__ == "__main__":
    key = jax.random.PRNGKey(0)
    kp, kt = jax.random.split(key)

    # Small NCHW example consistent with the module.
    pred = jax.random.normal(kp, (2, 4, 16, 16), dtype=jnp.float32)
    true = jax.random.normal(kt, (2, 4, 16, 16), dtype=jnp.float32)

    epoch = 200  # exercises the e150 > 0 branch of default_scale
    loss = jax.block_until_ready(epoch_aware_mse_loss(pred, true, epoch=epoch))
    ref = jnp.mean((pred - true) ** 2) * default_scale(epoch)
    assert jnp.allclose(loss, ref, rtol=1e-5, atol=1e-6), (loss, ref)

    # epoch=0 (scale == 1) path.
    loss0 = jax.block_until_ready(epoch_aware_mse_loss(pred, true, epoch=0))
    ref0 = jnp.mean((pred - true) ** 2)
    assert jnp.allclose(loss0, ref0, rtol=1e-5, atol=1e-6), (loss0, ref0)

    # Element count NOT a multiple of 128 (exercises the minimal remnant pad).
    kp2, kt2 = jax.random.split(kt)
    pred2 = jax.random.normal(kp2, (2, 3, 5, 7), dtype=jnp.float32)
    true2 = jax.random.normal(kt2, (2, 3, 5, 7), dtype=jnp.float32)
    loss2 = jax.block_until_ready(epoch_aware_mse_loss(pred2, true2, epoch=epoch))
    ref2 = jnp.mean((pred2 - true2) ** 2) * default_scale(epoch)
    assert jnp.allclose(loss2, ref2, rtol=1e-5, atol=1e-6), (loss2, ref2)

    # Larger aligned case that exercises a ragged last tile (masked in-kernel,
    # zero wrapper-side padding), multiple grid steps, and bf16 inputs.
    kp3, kt3 = jax.random.split(kt2)
    pred3 = jax.random.normal(kp3, (3, 8, 64, 64), dtype=jnp.bfloat16)
    true3 = jax.random.normal(kt3, (3, 8, 64, 64), dtype=jnp.bfloat16)
    loss3 = jax.block_until_ready(
        epoch_aware_mse_loss(pred3, true3, epoch=epoch, tile_rows=64, num_chunks=2))
    ref3 = jnp.mean((pred3.astype(jnp.float32) - true3.astype(jnp.float32)) ** 2) \
        * default_scale(epoch)
    assert jnp.allclose(loss3, ref3, rtol=1e-3, atol=1e-4), (loss3, ref3)

    print("KERNEL_OK")
</pallas_src>

<mosaic_0001>
module attributes {stable_mosaic.version = 11 : i64} {
  func.func @_sq_diff_sum_kernel(%arg0: i32, %arg1: i32, %arg2: memref<32x128xf32, #tpu.memory_space<vmem>>, %arg3: memref<32x128xf32, #tpu.memory_space<vmem>>, %arg4: memref<1x32x128xf32, #tpu.memory_space<vmem>>) attributes {dimension_semantics = [#tpu.dimension_semantics<parallel>, #tpu.dimension_semantics<arbitrary>], iteration_bounds = array<i64: 1, 1>, scalar_prefetch = 0 : i64, scratch_operands = 0 : i64, tpu.core_type = #tpu.core_type<tc>, window_params = [{transform_indices = @transform_0, window_bounds = array<i64: 32, 128>}, {transform_indices = @transform_1, window_bounds = array<i64: 32, 128>}, {transform_indices = @transform_2, window_bounds = array<i64: 1, 32, 128>}]} {
    %c1_i32 = arith.constant 1 : i32
    %0 = arith.muli %arg0, %c1_i32 : i32
    %1 = arith.addi %0, %arg1 : i32
    %c32_i32 = arith.constant 32 : i32
    %2 = arith.muli %1, %c32_i32 : i32
    %c0_i32 = arith.constant 0 : i32
    %3 = arith.cmpi eq, %arg1, %c0_i32 : i32
    %4 = arith.extui %3 : i1 to i32
    %c0_i32_0 = arith.constant 0 : i32
    %5 = arith.cmpi ne, %4, %c0_i32_0 : i32
    scf.if %5 {
      %cst = arith.constant 0.000000e+00 : f32
      %14 = vector.broadcast %cst : f32 to vector<32x128xf32>
      %c0 = arith.constant 0 : index
      %c0_7 = arith.constant 0 : index
      %c0_8 = arith.constant 0 : index
      %15 = vector.load %arg4[%c0, %c0_7, %c0_8] : memref<1x32x128xf32, #tpu.memory_space<vmem>>, vector<1x32x128xf32>
      %16 = vector.shape_cast %15 : vector<1x32x128xf32> to vector<32x128xf32>
      %17 = vector.shape_cast %14 : vector<32x128xf32> to vector<1x32x128xf32>
      tpu.vector_store %arg4[%c0, %c0_7, %c0_8], %17 {strides = array<i32>} : memref<1x32x128xf32, #tpu.memory_space<vmem>>, vector<1x32x128xf32>,
    } else {
    }
    %c32_i32_1 = arith.constant 32 : i32
    %6 = arith.addi %2, %c32_i32_1 : i32
    %c32_i32_2 = arith.constant 32 : i32
    %7 = arith.cmpi sle, %6, %c32_i32_2 : i32
    %8 = arith.extui %7 : i1 to i32
    %c0_i32_3 = arith.constant 0 : i32
    %9 = arith.cmpi ne, %8, %c0_i32_3 : i32
    scf.if %9 {
      %c0 = arith.constant 0 : index
      %c0_7 = arith.constant 0 : index
      %14 = vector.load %arg2[%c0, %c0_7] : memref<32x128xf32, #tpu.memory_space<vmem>>, vector<32x128xf32>
      %c0_8 = arith.constant 0 : index
      %c0_9 = arith.constant 0 : index
      %15 = vector.load %arg3[%c0_8, %c0_9] : memref<32x128xf32, #tpu.memory_space<vmem>>, vector<32x128xf32>
      %16 = arith.subf %14, %15 : vector<32x128xf32>
      %17 = arith.mulf %16, %16 : vector<32x128xf32>
      %c0_10 = arith.constant 0 : index
      %c0_11 = arith.constant 0 : index
      %c0_12 = arith.constant 0 : index
      %18 = vector.load %arg4[%c0_10, %c0_11, %c0_12] : memref<1x32x128xf32, #tpu.memory_space<vmem>>, vector<1x32x128xf32>
      %19 = vector.shape_cast %18 : vector<1x32x128xf32> to vector<32x128xf32>
      %20 = vector.shape_cast %17 : vector<32x128xf32> to vector<1x32x128xf32>
      %cst = arith.constant dense<0.000000e+00> : vector<32x128xf32>
      %21 = vector.multi_reduction <add>, %20, %cst [0] : vector<1x32x128xf32> to vector<32x128xf32>
      %22 = arith.addf %19, %21 : vector<32x128xf32>
      %c0_13 = arith.constant 0 : index
      %c0_14 = arith.constant 0 : index
      %c0_15 = arith.constant 0 : index
      %23 = vector.load %arg4[%c0_13, %c0_14, %c0_15] : memref<1x32x128xf32, #tpu.memory_space<vmem>>, vector<1x32x128xf32>
      %24 = vector.shape_cast %23 : vector<1x32x128xf32> to vector<32x128xf32>
      %25 = vector.shape_cast %22 : vector<32x128xf32> to vector<1x32x128xf32>
      tpu.vector_store %arg4[%c0_13, %c0_14, %c0_15], %25 {strides = array<i32>} : memref<1x32x128xf32, #tpu.memory_space<vmem>>, vector<1x32x128xf32>,
    } else {
    }
    %c32_i32_4 = arith.constant 32 : i32
    %10 = arith.addi %2, %c32_i32_4 : i32
    %c32_i32_5 = arith.constant 32 : i32
    %11 = arith.cmpi sgt, %10, %c32_i32_5 : i32
    %12 = arith.extui %11 : i1 to i32
    %c0_i32_6 = arith.constant 0 : i32
    %13 = arith.cmpi ne, %12, %c0_i32_6 : i32
    scf.if %13 {
      %c0 = arith.constant 0 : index
      %c0_7 = arith.constant 0 : index
      %14 = vector.load %arg2[%c0, %c0_7] : memref<32x128xf32, #tpu.memory_space<vmem>>, vector<32x128xf32>
      %c0_8 = arith.constant 0 : index
      %c0_9 = arith.constant 0 : index
      %15 = vector.load %arg3[%c0_8, %c0_9] : memref<32x128xf32, #tpu.memory_space<vmem>>, vector<32x128xf32>
      %16 = arith.subf %14, %15 : vector<32x128xf32>
      %17 = arith.mulf %16, %16 : vector<32x128xf32>
      %18 = tpu.iota {dimensions = array<i32: 0>} : vector<32x128xi32>
      %19 = vector.broadcast %2 : i32 to vector<32x128xi32>
      %20 = arith.addi %19, %18 : vector<32x128xi32>
      %c32_i32_10 = arith.constant 32 : i32
      %21 = vector.broadcast %c32_i32_10 : i32 to vector<32x128xi32>
      %22 = arith.cmpi slt, %20, %21 : vector<32x128xi32>
      %cst = arith.constant 0.000000e+00 : f32
      %23 = vector.broadcast %cst : f32 to vector<32x128xf32>
      %24 = arith.select %22, %17, %23 : vector<32x128xi1>, vector<32x128xf32>
      %c0_11 = arith.constant 0 : index
      %c0_12 = arith.constant 0 : index
      %c0_13 = arith.constant 0 : index
      %25 = vector.load %arg4[%c0_11, %c0_12, %c0_13] : memref<1x32x128xf32, #tpu.memory_space<vmem>>, vector<1x32x128xf32>
      %26 = vector.shape_cast %25 : vector<1x32x128xf32> to vector<32x128xf32>
      %27 = vector.shape_cast %24 : vector<32x128xf32> to vector<1x32x128xf32>
      %cst_14 = arith.constant dense<0.000000e+00> : vector<32x128xf32>
      %28 = vector.multi_reduction <add>, %27, %cst_14 [0] : vector<1x32x128xf32> to vector<32x128xf32>
      %29 = arith.addf %26, %28 : vector<32x128xf32>
      %c0_15 = arith.constant 0 : index
      %c0_16 = arith.constant 0 : index
      %c0_17 = arith.constant 0 : index
      %30 = vector.load %arg4[%c0_15, %c0_16, %c0_17] : memref<1x32x128xf32, #tpu.memory_space<vmem>>, vector<1x32x128xf32>
      %31 = vector.shape_cast %30 : vector<1x32x128xf32> to vector<32x128xf32>
      %32 = vector.shape_cast %29 : vector<32x128xf32> to vector<1x32x128xf32>
      tpu.vector_store %arg4[%c0_15, %c0_16, %c0_17], %32 {strides = array<i32>} : memref<1x32x128xf32, #tpu.memory_space<vmem>>, vector<1x32x128xf32>,
    } else {
    }
    return
  }
  func.func @transform_0(%arg0: i32, %arg1: i32) -> (i32, i32) {
    %c1_i32 = arith.constant 1 : i32
    %0 = arith.muli %arg0, %c1_i32 : i32
    %1 = arith.addi %0, %arg1 : i32
    %c0_i32 = arith.constant 0 : i32
    %c0_i32_0 = arith.constant 0 : i32
    return %1, %c0_i32 : i32, i32
  }
  func.func @transform_1(%arg0: i32, %arg1: i32) -> (i32, i32) {
    %c1_i32 = arith.constant 1 : i32
    %0 = arith.muli %arg0, %c1_i32 : i32
    %1 = arith.addi %0, %arg1 : i32
    %c0_i32 = arith.constant 0 : i32
    %c0_i32_0 = arith.constant 0 : i32
    return %1, %c0_i32 : i32, i32
  }
  func.func @transform_2(%arg0: i32, %arg1: i32) -> (i32, i32, i32) {
    %c0_i32 = arith.constant 0 : i32
    %c0_i32_0 = arith.constant 0 : i32
    %c0_i32_1 = arith.constant 0 : i32
    return %arg0, %c0_i32, %c0_i32_0 : i32, i32, i32
  }
}

</mosaic_0001>

<bundles_post_ra>
// kernel: tpu_custom_call.1
= control target key start
LH: loop header
LB: loop body
LE: loop exit
PB: predicated region body
PF: predicated region fallthrough
CT: control target
= control target key end

     0   :  { %7 = vsyncpa [#allocation3], 0  ;;  %s314_s0 = inlined_call_operand.hbm [shape: f32[32,128], index: 0, kind: input, shape index: {}]   ;;  %s315_s1 = inlined_call_operand.hbm [shape: f32[32,128], index: 1, kind: input, shape index: {}]   ;;  %s316_s2 = inlined_call_operand.hbm [shape: f32[1,32,128], index: 2, kind: output, shape index: {}]  }
   0x1   :  { %8 = vsyncpa [#allocation6], 0 }
   0x2   :  { %9 = vsyncpa [#allocation4], 0  ;;  %s249_s9 = smov [#allocation2]   ;;  %s177_s13 = scalar_lea.hbm %s314_s0, 512 }
   0x3   :  { %s19_s10 = sshll.u32 %s249_s9, 4  ;;  %p178_p0 = scmp.ne.s32.totalorder %s314_s0, %s177_s13  ;;  %s20_s10 = int_to_ptr.vmem [resolvable:$true] %s19_s10 }
   0x4   :  { %p181_p1 = scmp.lt.u32.totalorder %s177_s13, %s314_s0 }
   0x6   :  { %p183_p2 = pnand %p181_p1, %p178_p0 }
   0x8   :  { %186 = shalt.err (!%p183_p2)
}
   0x9   :  { %s187_s18 = scalar_lea.vmem %s20_s10, 512  ;;  %p192_p4 = scmp.lt.s32.totalorder %s20_s10, %s20_s10 }
   0xa   :  { %p188_p3 = scmp.ne.s32.totalorder %s20_s10, %s187_s18  ;;  %p193_p5 = scmp.lt.s32.totalorder %s187_s18, %s187_s18 }
   0xc   :  { %p194_p6 = por %p193_p5, %p192_p4 }
   0xe   :  { %p195_p7 = pnand %p194_p6, %p188_p3 }
  0x10   :  { %198 = shalt.err (!%p195_p7)
}
  0x11   :  { %s250_s19 = smov 128   ;;  %s251_s20 = smov 8  }
  0x12   :  { %25 = dma.hbm_to_vmem [thread:$0]  %s314_s0, 512, %s20_s10, [#allocation3], %s250_s19, %s250_s19, %s251_s20  }
  0x13   :  { %s252_s23 = smov [#allocation5]   ;;  %s199_s27 = scalar_lea.hbm %s315_s1, 512 }
  0x14   :  { %s35_s24 = sshll.u32 %s252_s23, 4  ;;  %p200_p8 = scmp.ne.s32.totalorder %s315_s1, %s199_s27  ;;  %s36_s24 = int_to_ptr.vmem [resolvable:$true] %s35_s24 }
  0x15   :  { %p203_p9 = scmp.lt.u32.totalorder %s199_s27, %s315_s1 }
  0x17   :  { %p205_p10 = pnand %p203_p9, %p200_p8 }
  0x19   :  { %208 = shalt.err (!%p205_p10)
}
  0x1a   :  { %s209_s4 = scalar_lea.vmem %s36_s24, 512  ;;  %p214_p12 = scmp.lt.s32.totalorder %s36_s24, %s36_s24 }
  0x1b   :  { %p210_p11 = scmp.ne.s32.totalorder %s36_s24, %s209_s4  ;;  %p215_p13 = scmp.lt.s32.totalorder %s209_s4, %s209_s4 }
  0x1d   :  { %p216_p0 = por %p215_p13, %p214_p12 }
  0x1f   :  { %p217_p1 = pnand %p216_p0, %p210_p11 }
  0x21   :  { %220 = shalt.err (!%p217_p1)
}
  0x22   :  { %41 = dma.hbm_to_vmem [thread:$0]  %s315_s1, 512, %s36_s24, [#allocation6], %s250_s19, %s250_s19, %s251_s20  }
  0x23   :  { %243 = dma.done.wait [#allocation3], 512  }
  0x24   :  { %244 = vsyncadd [#allocation3], 4294966784 }
  0x25   :  { %245 = dma.done.wait [#allocation6], 512  }
  0x26   :  { %246 = vsyncadd [#allocation6], 4294966784  ;;  %v67_v0 = vld [vmem:[#allocation2] sm:$0xff]  ;;  %v68_v2 = vld [vmem:[#allocation2 + $0x8] sm:$0xff]  ;;  %s253_s1 = smov [#allocation7]  }
  0x27   :  { %v71_v1 = vld [vmem:[#allocation5] sm:$0xff]  ;;  %v72_v4 = vld [vmem:[#allocation5 + $0x8] sm:$0xff]  ;;  %v69_v5 = vld [vmem:[#allocation2 + $0x10] sm:$0xff]  ;;  %s158_s6 = sshll.u32 %s253_s1, 4  ;;  %s159_s6 = int_to_ptr.vmem [resolvable:$true] %s158_s6 }
  0x28   :  { %v75_v3 = vsub.f32 %v67_v0, %v71_v1  ;;  %v73_v6 = vld [vmem:[#allocation5 + $0x10] sm:$0xff]  ;;  %v76_v7 = vsub.f32 %v68_v2, %v72_v4  ;;  %v70_v9 = vld [vmem:[#allocation2 + $0x18] sm:$0xff]  ;;  %s221_s7 = scalar_lea.vmem %s159_s6, 512  ;;  %p226_p3 = scmp.lt.s32.totalorder %s159_s6, %s159_s6 }
  0x29   :  { %v77_v8 = vsub.f32 %v69_v5, %v73_v6  ;;  %v74_v10 = vld [vmem:[#allocation5 + $0x18] sm:$0xff]  ;;  %p222_p2 = scmp.ne.s32.totalorder %s159_s6, %s221_s7  ;;  %p227_p4 = scmp.lt.s32.totalorder %s221_s7, %s221_s7 }
  0x2a   :  { %v79_v11 = vmul.f32 %v75_v3, %v75_v3  ;;  %v78_v12 = vsub.f32 %v70_v9, %v74_v10  ;;  %v80_v13 = vmul.f32 %v76_v7, %v76_v7 }
  0x2b   :  { %v81_v14 = vmul.f32 %v77_v8, %v77_v8  ;;  %p228_p5 = por %p227_p4, %p226_p3 }
  0x2c   :  { %v82_v15 = vmul.f32 %v78_v12, %v78_v12  ;;  %95 = vst [vmem:[#allocation7] sm:$0xff] %v79_v11  ;;  %96 = vst [vmem:[#allocation7 + $0x8] sm:$0xff] %v80_v13 }
  0x2d   :  { %97 = vst [vmem:[#allocation7 + $0x10] sm:$0xff] %v81_v14  ;;  %p229_p6 = pnand %p228_p5, %p222_p2 }
  0x2e   :  { %98 = vst [vmem:[#allocation7 + $0x18] sm:$0xff] %v82_v15 }
  0x2f   :  { %232 = shalt.err (!%p229_p6)
}
  0x30   :  { %s233_s10 = scalar_lea.hbm %s316_s2, 512 }
  0x31   :  { %p234_p7 = scmp.ne.s32.totalorder %s316_s2, %s233_s10  ;;  %p237_p8 = scmp.lt.u32.totalorder %s233_s10, %s316_s2 }
  0x33   :  { %p239_p9 = pnand %p237_p8, %p234_p7 }
  0x35   :  { %242 = shalt.err (!%p239_p9)
}
  0x36   :  { %164 = dma.vmem_to_hbm [thread:$0]  %s159_s6, 512, %s316_s2, [#allocation4], %s250_s19, %s250_s19, %s251_s20  }
  0x37   :  { %247 = dma.done.wait [#allocation4], 512  }
  0x38   :  { %248 = vsyncadd [#allocation4], 4294966784 }
  0x39   :  { %168 = vsyncpa [#allocation3], 1 }
  0x3a   :  { %169 = vsyncpa [#allocation6], 1 }
  0x3b   :  { %170 = vsyncpa [#allocation4], 1 }

</bundles_post_ra>
